<compile_context>
chip_gen: v6e
topology: v6e:2x2x1
jax: 0.10.0
libtpu: 0.0.40
codegen_flags: <defaults>
</compile_context>

<pallas_src>
import functools

import jax
import jax.numpy as jnp
from jax.experimental import pallas as pl
from jax.experimental.pallas import tpu as pltpu

_LANE = 128


def _round_up(x, m):
    return ((x + m - 1) // m) * m


def embedding_head_kernel(x_ref, convw_ref, bnscale_ref, bnshift_ref, wcat_ref,
                          neck_ref, logits_ref, pred_ref, acc_ref,
                          *, lane_groups, cls_scale):
    """Grid = (batch_blocks [parallel], spatial_blocks [arbitrary, last]).

    x_ref:       (TB, C, T_HW)   activation tile, native channel-major layout
    convw_ref:   (C, E_pad)      1x1 conv weight^T, lane-padded, pre-scaled by 1/HW
    bnscale_ref: (1, E_pad)      folded BN scale  (gamma / sqrt(var+eps))
    bnshift_ref: (1, E_pad)      folded BN shift  (beta - mean*scale)
    wcat_ref:    (E_pad, N_pad)  [w1; w2; w3]^T, zero-padded
    neck_ref:    (TB, E_pad)     bottleneck output ('features', neck_feat='after')
    logits_ref:  (TB, N_pad)     concatenated classifier logits
    pred_ref:    (TB, N_pad)     logits * cls_scale (pred_class_logits)
    acc_ref:     (TB, C, 128) f32 if lane_groups > 0 else (TB, C) f32 scratch
    """
    k = pl.program_id(1)

    @pl.when(k == 0)
    def _init():
        acc_ref[...] = jnp.zeros_like(acc_ref)

    if lane_groups > 0:
        # Multi-step spatial reduction: accumulate 128-lane groups with pure
        # VPU adds (dtype promote fused per group -> bounded vreg pressure,
        # no full-tile f32 copy).  The cross-lane XLU reduce is deferred to
        # the finalize step, so per-step work stays off the 2-unit XLU.
        acc = acc_ref[...]
        for g in range(lane_groups):
            acc = acc + x_ref[:, :, g * _LANE:(g + 1) * _LANE].astype(jnp.float32)
        acc_ref[...] = acc
    else:
        # Single spatial step (or non-128-aligned HW): one fused-promote reduce.
        acc_ref[...] += jnp.sum(x_ref[...], axis=-1, dtype=jnp.float32)

    @pl.when(k == pl.num_programs(1) - 1)
    def _finalize():
        if lane_groups > 0:
            pool = jnp.sum(acc_ref[...], axis=-1)   # one XLU reduce per batch block
        else:
            pool = acc_ref[...]                     # already (TB, C)
        # 1x1 conv (no bias) == pool @ conv_w^T ; 1/HW pre-folded into conv_w.
        emb = jnp.dot(pool, convw_ref[...], preferred_element_type=jnp.float32)
        # eval-mode BatchNorm folded into per-channel affine.
        neck = emb * bnscale_ref[...] + bnshift_ref[...]
        neck_ref[...] = neck.astype(neck_ref.dtype)
        # Fused classifier: one lane-dense matmul for all three heads.
        logits = jnp.dot(neck, wcat_ref[...], preferred_element_type=jnp.float32)
        logits_ref[...] = logits.astype(logits_ref.dtype)
        # pred_class_logits = logits * s, folded into the epilogue.
        pred_ref[...] = (logits * cls_scale).astype(pred_ref.dtype)


def _vmem_budget_bytes():
    """Per-generation VMEM budget with ~15% headroom (v7x: ~54 MiB, v6e/v5e: ~108 MiB)."""
    cap = 64 << 20          # safe fallback (v7x per-TC physical size)
    try:
        cap = int(pltpu.get_tpu_info().vmem_capacity_bytes)
    except Exception:
        pass
    return max(32 << 20, int(0.85 * cap))


def _choose_tiling(B, C, HW, itemsize, E_pad, N_pad, budget, max_x_block_bytes=None):
    """Pick (TB, T_HW, lane_acc) subject to an explicit VMEM budget guardrail.

    Preference order:
      1. unsplit spatial axis (contiguous DMA rows) -- shrink TB before splitting HW
      2. largest TB that keeps >= 2 batch blocks (both v7x TensorCores busy)
      3. largest TB overall
    `max_x_block_bytes` is a test hook to force smaller activation blocks.
    """
    if B % 8 == 0:
        tb_all = [tb for tb in range(B, 7, -8) if B % tb == 0]
    else:
        # TODO(synk): B not a multiple of 8 gives a sublane-underfilled batch
        # block; pad B to 8 host-side for small-batch inference if needed.
        tb_all = [B]
    tb_order = ([tb for tb in tb_all if B // tb >= 2]
                + [tb for tb in tb_all if B // tb < 2])

    sp_order = [HW]
    if HW % _LANE == 0:
        sp_order += [t for t in range(HW - _LANE, 0, -_LANE) if HW % t == 0]

    w_bytes = (C * E_pad + 2 * E_pad + E_pad * N_pad) * 4

    def plan(tb, t_hw):
        lane_acc = (t_hw % _LANE == 0) and (HW // t_hw > 1)
        x_blk = tb * C * t_hw * itemsize
        out_blk = (tb * E_pad + 2 * tb * N_pad) * 4
        acc_bytes = tb * max(C, 8) * (_LANE if lane_acc else 1) * 4
        # 2x activation (double-buffered) + conservatively 2x weights/outputs
        # under the default pipeline, + persistent accumulator scratch.
        total = 2 * x_blk + 2 * w_bytes + 2 * out_blk + acc_bytes
        return lane_acc, x_blk, total

    for t_hw in sp_order:
        for tb in tb_order:
            lane_acc, x_blk, total = plan(tb, t_hw)
            if max_x_block_bytes is not None and x_blk > max_x_block_bytes:
                continue
            if total <= budget:
                return tb, t_hw, lane_acc
    # Nothing fit the budget: deterministic smallest-config fallback.
    tb = min(tb_all)
    sp_ok = [t for t in sp_order
             if max_x_block_bytes is None or tb * C * t * itemsize <= max_x_block_bytes]
    t_hw = min(sp_ok) if sp_ok else min(sp_order)
    lane_acc, _, _ = plan(tb, t_hw)
    return tb, t_hw, lane_acc


def embedding_head_forward(features_nchw, params, *, scale=1.0,
                           max_x_block_bytes=None):
    """features_nchw: (B, C, H, W).  Returns dict like the PyTorch module."""
    B, C, H, W = features_nchw.shape
    HW = H * W

    conv_w = params["conv_w"]                      # (E, C)
    gamma, beta = params["bn_gamma"], params["bn_beta"]
    rmean, rvar = params["bn_mean"], params["bn_var"]
    eps = params["bn_eps"]
    w1, w2, w3 = params["w1"], params["w2"], params["w3"]   # (Ni, E)

    E = conv_w.shape[0]
    N1, N2, N3 = w1.shape[0], w2.shape[0], w3.shape[0]
    N = N1 + N2 + N3

    # Lane-pad the small matmul dims to 128 so every MXU op / store is full-width.
    E_pad = _round_up(max(E, 1), 128)
    N_pad = _round_up(max(N, 1), 128)

    # --- parameter prep (tiny tensors; done once in XLA) ---------------------
    inv_std = gamma / jnp.sqrt(rvar + eps)                                  # (E,)
    bn_scale = jnp.pad(inv_std.reshape(1, E).astype(jnp.float32),
                       ((0, 0), (0, E_pad - E)))                            # (1, E_pad)
    bn_shift = jnp.pad((beta - rmean * inv_std).reshape(1, E).astype(jnp.float32),
                       ((0, 0), (0, E_pad - E)))                            # (1, E_pad)
    # 1/HW folded into the conv weight -> no per-block multiply in the epilogue.
    conv_w_t = jnp.pad((conv_w.T * (1.0 / HW)).astype(jnp.float32),
                       ((0, 0), (0, E_pad - E)))                            # (C, E_pad)
    w_cat_t = jnp.pad(jnp.concatenate([w1, w2, w3], axis=0).T.astype(jnp.float32),
                      ((0, E_pad - E), (0, N_pad - N)))                     # (E_pad, N_pad)

    # --- activation: native channel-major layout, NO transpose --------------
    x = features_nchw.reshape(B, C, HW)            # free reshape; one HBM pass

    itemsize = jnp.dtype(x.dtype).itemsize
    budget = _vmem_budget_bytes()
    TB, T_HW, lane_acc = _choose_tiling(B, C, HW, itemsize, E_pad, N_pad, budget,
                                        max_x_block_bytes=max_x_block_bytes)
    grid = (B // TB, HW // T_HW)                   # (parallel batch, arbitrary reduce)
    lane_groups = (T_HW // _LANE) if lane_acc else 0
    acc_shape = (TB, C, _LANE) if lane_acc else (TB, C)

    w_bytes = (C * E_pad + 2 * E_pad + E_pad * N_pad) * 4
    cost = pl.CostEstimate(
        flops=B * C * HW + 2 * B * C * E_pad + 2 * B * E_pad * N_pad,
        transcendentals=0,
        bytes_accessed=B * C * HW * itemsize + w_bytes + B * (E_pad + 2 * N_pad) * 4,
    )

    kernel = functools.partial(embedding_head_kernel,
                               lane_groups=lane_groups,
                               cls_scale=float(scale))

    neck_p, logits_p, pred_p = pl.pallas_call(
        kernel,
        out_shape=(
            jax.ShapeDtypeStruct((B, E_pad), jnp.float32),
            jax.ShapeDtypeStruct((B, N_pad), jnp.float32),
            jax.ShapeDtypeStruct((B, N_pad), jnp.float32),
        ),
        grid_spec=pltpu.PrefetchScalarGridSpec(
            num_scalar_prefetch=0,
            grid=grid,
            in_specs=[
                # activation tile: walks batch (i) and spatial (k)
                pl.BlockSpec((TB, C, T_HW), lambda i, k: (i, 0, k)),
                # weights: constant block index -> resident in VMEM across the grid
                pl.BlockSpec((C, E_pad), lambda i, k: (0, 0)),
                pl.BlockSpec((1, E_pad), lambda i, k: (0, 0)),
                pl.BlockSpec((1, E_pad), lambda i, k: (0, 0)),
                pl.BlockSpec((E_pad, N_pad), lambda i, k: (0, 0)),
            ],
            out_specs=(
                pl.BlockSpec((TB, E_pad), lambda i, k: (i, 0)),
                pl.BlockSpec((TB, N_pad), lambda i, k: (i, 0)),
                pl.BlockSpec((TB, N_pad), lambda i, k: (i, 0)),
            ),
            scratch_shapes=[pltpu.VMEM(acc_shape, jnp.float32)],
        ),
        compiler_params=pltpu.CompilerParams(
            dimension_semantics=("parallel", "arbitrary"),
            vmem_limit_bytes=budget,
        ),
        cost_estimate=cost,
    )(x, conv_w_t, bn_scale, bn_shift, w_cat_t)

    # Un-pad / split the fused outputs (tiny slices, done once in XLA).
    neck = neck_p[:, :E]
    l1, l2, l3 = logits_p[:, :N1], logits_p[:, N1:N1 + N2], logits_p[:, N1 + N2:N]
    p1, p2, p3 = pred_p[:, :N1], pred_p[:, N1:N1 + N2], pred_p[:, N1 + N2:N]

    # cls_type='Linear': cls_layer is identity on logits.
    # TODO(synk): margin-based cls_types (ArcSoftmax/CircleSoftmax, normalized
    # logits) and the optional `paths` concat are config paths not covered here.
    return {
        "cls_outputs1": l1,
        "cls_outputs2": l2,
        "cls_outputs3": l3,
        "pred_class_logits1": p1,
        "pred_class_logits2": p2,
        "pred_class_logits3": p3,
        "features": neck,              # neck_feat == 'after'
    }


def _reference(features_nchw, params):
    """Pure-JAX reference mirroring the PyTorch forward (Linear cls)."""
    pool = jnp.mean(features_nchw.astype(jnp.float32), axis=(2, 3))   # (B, C)
    emb = pool @ params["conv_w"].T                                   # (B, E)
    inv = params["bn_gamma"] / jnp.sqrt(params["bn_var"] + params["bn_eps"])
    neck = (emb - params["bn_mean"]) * inv + params["bn_beta"]
    l1 = neck @ params["w1"].T
    l2 = neck @ params["w2"].T
    l3 = neck @ params["w3"].T
    return neck, l1, l2, l3


def _check(out, refs, scale, atol, rtol):
    neck_r, l1_r, l2_r, l3_r = refs
    assert jnp.allclose(out["features"], neck_r, atol=atol, rtol=rtol)
    assert jnp.allclose(out["cls_outputs1"], l1_r, atol=atol, rtol=rtol)
    assert jnp.allclose(out["cls_outputs2"], l2_r, atol=atol, rtol=rtol)
    assert jnp.allclose(out["cls_outputs3"], l3_r, atol=atol, rtol=rtol)
    assert jnp.allclose(out["pred_class_logits1"], l1_r * scale, atol=atol, rtol=rtol)
    assert jnp.allclose(out["pred_class_logits2"], l2_r * scale, atol=atol, rtol=rtol)
    assert jnp.allclose(out["pred_class_logits3"], l3_r * scale, atol=atol, rtol=rtol)


if __name__ == "__main__":
    # Small deterministic config (feat_dim=8, embedding_dim=8, 3 class heads).
    B, C, H, W = 16, 8, 16, 16
    E = 8
    N1, N2, N3 = 16, 12, 10
    scale = 1.0                        # Linear cls: s = 1

    key = jax.random.PRNGKey(0)
    ks = jax.random.split(key, 8)
    features = jax.random.normal(ks[0], (B, C, H, W), dtype=jnp.float32)

    params = {
        # Conv2d(feat_dim, embedding_dim, 1, 1, bias=False) -> weight (E, C, 1, 1); kept as (E, C)
        "conv_w": jax.random.normal(ks[1], (E, C), dtype=jnp.float32) * jnp.sqrt(2.0 / C),
        # BatchNorm(E), bias_freeze -> gamma=1, beta=0; running stats synthetic
        "bn_gamma": jnp.ones((E,), jnp.float32),
        "bn_beta": jnp.zeros((E,), jnp.float32),
        "bn_mean": 0.1 * jax.random.normal(ks[2], (E,), dtype=jnp.float32),
        "bn_var": jnp.abs(jax.random.normal(ks[3], (E,), dtype=jnp.float32)) + 1.0,
        "bn_eps": jnp.float32(1e-5),
        # classifier weights: nn.init.normal_(std=0.01)
        "w1": 0.01 * jax.random.normal(ks[4], (N1, E), dtype=jnp.float32),
        "w2": 0.01 * jax.random.normal(ks[5], (N2, E), dtype=jnp.float32),
        "w3": 0.01 * jax.random.normal(ks[6], (N3, E), dtype=jnp.float32),
    }

    # Run A: default tiling -> single spatial step, 2 batch blocks ("parallel").
    out_a = embedding_head_forward(features, params, scale=scale)
    jax.block_until_ready(out_a)
    _check(out_a, _reference(features, params), scale, atol=1e-4, rtol=1e-4)

    # Run B: force a split spatial axis (HW=512, block cap 64 KiB -> T_HW=256,
    # 2 reduction steps x 2 lane groups) to exercise the VPU lane-group
    # accumulator + deferred XLU reduce path.
    feat_b = jax.random.normal(ks[7], (8, C, 16, 32), dtype=jnp.float32)
    out_b = embedding_head_forward(feat_b, params, scale=scale,
                                   max_x_block_bytes=64 * 1024)
    jax.block_until_ready(out_b)
    _check(out_b, _reference(feat_b, params), scale, atol=1e-4, rtol=1e-4)

    # Run C: bf16 activations (f32 accumulation in-kernel), looser tolerance.
    out_c = embedding_head_forward(features.astype(jnp.bfloat16), params, scale=scale)
    jax.block_until_ready(out_c)
    _check(out_c, _reference(features, params), scale, atol=1e-2, rtol=5e-2)

    print("KERNEL_OK")
</pallas_src>

<mosaic_0001>
module attributes {stable_mosaic.version = 11 : i64} {
  func.func @embedding_head_kernel(%arg0: i32, %arg1: i32, %arg2: memref<8x8x256xf32, #tpu.memory_space<vmem>>, %arg3: memref<8x128xf32, #tpu.memory_space<vmem>>, %arg4: memref<1x128xf32, #tpu.memory_space<vmem>>, %arg5: memref<1x128xf32, #tpu.memory_space<vmem>>, %arg6: memref<128x128xf32, #tpu.memory_space<vmem>>, %arg7: memref<8x128xf32, #tpu.memory_space<vmem>>, %arg8: memref<8x128xf32, #tpu.memory_space<vmem>>, %arg9: memref<8x128xf32, #tpu.memory_space<vmem>>, %arg10: memref<8x8xf32, #tpu.memory_space<vmem>>) attributes {dimension_semantics = [#tpu.dimension_semantics<parallel>, #tpu.dimension_semantics<arbitrary>], iteration_bounds = array<i64: 2, 1>, scalar_prefetch = 0 : i64, scratch_operands = 1 : i64, tpu.core_type = #tpu.core_type<tc>, window_params = [{transform_indices = @transform_0, window_bounds = array<i64: 8, 8, 256>}, {pipeline_mode = #tpu.pipeline_mode<synchronous>, transform_indices = @transform_1, window_bounds = array<i64: 8, 128>}, {pipeline_mode = #tpu.pipeline_mode<synchronous>, transform_indices = @transform_2, window_bounds = array<i64: 1, 128>}, {pipeline_mode = #tpu.pipeline_mode<synchronous>, transform_indices = @transform_3, window_bounds = array<i64: 1, 128>}, {pipeline_mode = #tpu.pipeline_mode<synchronous>, transform_indices = @transform_4, window_bounds = array<i64: 128, 128>}, {transform_indices = @transform_5, window_bounds = array<i64: 8, 128>}, {transform_indices = @transform_6, window_bounds = array<i64: 8, 128>}, {transform_indices = @transform_7, window_bounds = array<i64: 8, 128>}]} {
    %c0_i32 = arith.constant 0 : i32
    %0 = arith.cmpi eq, %arg1, %c0_i32 : i32
    %1 = arith.extui %0 : i1 to i32
    %c0_i32_0 = arith.constant 0 : i32
    %2 = arith.cmpi ne, %1, %c0_i32_0 : i32
    scf.if %2 {
      %cst_9 = arith.constant 0.000000e+00 : f32
      %11 = vector.broadcast %cst_9 : f32 to vector<8x8xf32>
      %c0_10 = arith.constant 0 : index
      %c0_11 = arith.constant 0 : index
      %12 = vector.load %arg10[%c0_10, %c0_11] : memref<8x8xf32, #tpu.memory_space<vmem>>, vector<8x8xf32>
      tpu.vector_store %arg10[%c0_10, %c0_11], %11 {strides = array<i32>} : memref<8x8xf32, #tpu.memory_space<vmem>>, vector<8x8xf32>,
    } else {
    }
    %c0 = arith.constant 0 : index
    %c0_1 = arith.constant 0 : index
    %3 = vector.load %arg10[%c0, %c0_1] : memref<8x8xf32, #tpu.memory_space<vmem>>, vector<8x8xf32>
    %c0_2 = arith.constant 0 : index
    %c0_3 = arith.constant 0 : index
    %c0_4 = arith.constant 0 : index
    %4 = vector.load %arg2[%c0_2, %c0_3, %c0_4] : memref<8x8x256xf32, #tpu.memory_space<vmem>>, vector<8x8x256xf32>
    %cst = arith.constant dense<0.000000e+00> : vector<8x8xf32>
    %5 = vector.multi_reduction <add>, %4, %cst [2] : vector<8x8x256xf32> to vector<8x8xf32>
    %6 = arith.addf %3, %5 : vector<8x8xf32>
    %c0_5 = arith.constant 0 : index
    %c0_6 = arith.constant 0 : index
    %7 = vector.load %arg10[%c0_5, %c0_6] : memref<8x8xf32, #tpu.memory_space<vmem>>, vector<8x8xf32>
    tpu.vector_store %arg10[%c0_5, %c0_6], %6 {strides = array<i32>} : memref<8x8xf32, #tpu.memory_space<vmem>>, vector<8x8xf32>,
    %c0_i32_7 = arith.constant 0 : i32
    %8 = arith.cmpi eq, %arg1, %c0_i32_7 : i32
    %9 = arith.extui %8 : i1 to i32
    %c0_i32_8 = arith.constant 0 : i32
    %10 = arith.cmpi ne, %9, %c0_i32_8 : i32
    scf.if %10 {
      %c0_9 = arith.constant 0 : index
      %c0_10 = arith.constant 0 : index
      %11 = vector.load %arg10[%c0_9, %c0_10] : memref<8x8xf32, #tpu.memory_space<vmem>>, vector<8x8xf32>
      %c0_11 = arith.constant 0 : index
      %c0_12 = arith.constant 0 : index
      %12 = vector.load %arg3[%c0_11, %c0_12] : memref<8x128xf32, #tpu.memory_space<vmem>>, vector<8x128xf32>
      %cst_13 = arith.constant dense<0.000000e+00> : vector<8x128xf32>
      %13 = tpu.matmul %11, %12, %cst_13 {dimension_numbers = #tpu.dot_dimension_numbers<[1], [0], [0], [1], [0, 0, 1, 1], [], []>} : vector<8x8xf32>, vector<8x128xf32>, vector<8x128xf32> -> vector<8x128xf32>
      %c0_14 = arith.constant 0 : index
      %c0_15 = arith.constant 0 : index
      %14 = vector.load %arg4[%c0_14, %c0_15] : memref<1x128xf32, #tpu.memory_space<vmem>>, vector<1x128xf32>
      %15 = vector.broadcast %14 : vector<1x128xf32> to vector<8x128xf32>
      %16 = arith.mulf %13, %15 : vector<8x128xf32>
      %c0_16 = arith.constant 0 : index
      %c0_17 = arith.constant 0 : index
      %17 = vector.load %arg5[%c0_16, %c0_17] : memref<1x128xf32, #tpu.memory_space<vmem>>, vector<1x128xf32>
      %18 = vector.broadcast %17 : vector<1x128xf32> to vector<8x128xf32>
      %19 = arith.addf %16, %18 : vector<8x128xf32>
      %c0_18 = arith.constant 0 : index
      %c0_19 = arith.constant 0 : index
      %20 = vector.load %arg7[%c0_18, %c0_19] : memref<8x128xf32, #tpu.memory_space<vmem>>, vector<8x128xf32>
      tpu.vector_store %arg7[%c0_18, %c0_19], %19 {strides = array<i32>} : memref<8x128xf32, #tpu.memory_space<vmem>>, vector<8x128xf32>,
      %c0_20 = arith.constant 0 : index
      %c0_21 = arith.constant 0 : index
      %21 = vector.load %arg6[%c0_20, %c0_21] : memref<128x128xf32, #tpu.memory_space<vmem>>, vector<128x128xf32>
      %cst_22 = arith.constant dense<0.000000e+00> : vector<8x128xf32>
      %22 = tpu.matmul %19, %21, %cst_22 {dimension_numbers = #tpu.dot_dimension_numbers<[1], [0], [0], [1], [0, 0, 1, 1], [], []>} : vector<8x128xf32>, vector<128x128xf32>, vector<8x128xf32> -> vector<8x128xf32>
      %c0_23 = arith.constant 0 : index
      %c0_24 = arith.constant 0 : index
      %23 = vector.load %arg8[%c0_23, %c0_24] : memref<8x128xf32, #tpu.memory_space<vmem>>, vector<8x128xf32>
      tpu.vector_store %arg8[%c0_23, %c0_24], %22 {strides = array<i32>} : memref<8x128xf32, #tpu.memory_space<vmem>>, vector<8x128xf32>,
      %cst_25 = arith.constant 1.000000e+00 : f32
      %24 = vector.broadcast %cst_25 : f32 to vector<8x128xf32>
      %25 = arith.mulf %22, %24 : vector<8x128xf32>
      %c0_26 = arith.constant 0 : index
      %c0_27 = arith.constant 0 : index
      %26 = vector.load %arg9[%c0_26, %c0_27] : memref<8x128xf32, #tpu.memory_space<vmem>>, vector<8x128xf32>
      tpu.vector_store %arg9[%c0_26, %c0_27], %25 {strides = array<i32>} : memref<8x128xf32, #tpu.memory_space<vmem>>, vector<8x128xf32>,
    } else {
    }
    return
  }
  func.func @transform_0(%arg0: i32, %arg1: i32) -> (i32, i32, i32) {
    %c0_i32 = arith.constant 0 : i32
    %c0_i32_0 = arith.constant 0 : i32
    return %arg0, %c0_i32, %arg1 : i32, i32, i32
  }
  func.func @transform_1(%arg0: i32, %arg1: i32) -> (i32, i32) {
    %c0_i32 = arith.constant 0 : i32
    %c0_i32_0 = arith.constant 0 : i32
    %c0_i32_1 = arith.constant 0 : i32
    return %c0_i32, %c0_i32_0 : i32, i32
  }
  func.func @transform_2(%arg0: i32, %arg1: i32) -> (i32, i32) {
    %c0_i32 = arith.constant 0 : i32
    %c0_i32_0 = arith.constant 0 : i32
    %c0_i32_1 = arith.constant 0 : i32
    return %c0_i32, %c0_i32_0 : i32, i32
  }
  func.func @transform_3(%arg0: i32, %arg1: i32) -> (i32, i32) {
    %c0_i32 = arith.constant 0 : i32
    %c0_i32_0 = arith.constant 0 : i32
    %c0_i32_1 = arith.constant 0 : i32
    return %c0_i32, %c0_i32_0 : i32, i32
  }
  func.func @transform_4(%arg0: i32, %arg1: i32) -> (i32, i32) {
    %c0_i32 = arith.constant 0 : i32
    %c0_i32_0 = arith.constant 0 : i32
    %c0_i32_1 = arith.constant 0 : i32
    return %c0_i32, %c0_i32_0 : i32, i32
  }
  func.func @transform_5(%arg0: i32, %arg1: i32) -> (i32, i32) {
    %c0_i32 = arith.constant 0 : i32
    %c0_i32_0 = arith.constant 0 : i32
    return %arg0, %c0_i32 : i32, i32
  }
  func.func @transform_6(%arg0: i32, %arg1: i32) -> (i32, i32) {
    %c0_i32 = arith.constant 0 : i32
    %c0_i32_0 = arith.constant 0 : i32
    return %arg0, %c0_i32 : i32, i32
  }
  func.func @transform_7(%arg0: i32, %arg1: i32) -> (i32, i32) {
    %c0_i32 = arith.constant 0 : i32
    %c0_i32_0 = arith.constant 0 : i32
    return %arg0, %c0_i32 : i32, i32
  }
}

</mosaic_0001>

<bundles_post_ra>
// kernel: tpu_custom_call.1
= control target key start
LH: loop header
LB: loop body
LE: loop exit
PB: predicated region body
PF: predicated region fallthrough
CT: control target
= control target key end

     0   :  { %s1607_s0 = inlined_call_operand.hbm [shape: f32[16,8,256], index: 0, kind: input, shape index: {}]   ;;  %s1608_s1 = inlined_call_operand.hbm [shape: f32[8,128], index: 1, kind: input, shape index: {}]   ;;  %s1609_s2 = inlined_call_operand.vmem [shape: f32[1,128], index: 2, kind: input, shape index: {}]   ;;  %s1610_s3 = inlined_call_operand.vmem [shape: f32[1,128], index: 3, kind: input, shape index: {}]   ;;  %s1611_s4 = inlined_call_operand.hbm [shape: f32[128,128], index: 4, kind: input, shape index: {}]   ;;  %s1612_s5 = inlined_call_operand.hbm [shape: f32[16,128], index: 5, kind: output, shape index: {0}]   ;;  %s1613_s6 = inlined_call_operand.hbm [shape: f32[16,128], index: 6, kind: output, shape index: {1}]   ;;  %s1614_s7 = inlined_call_operand.hbm [shape: f32[16,128], index: 7, kind: output, shape index: {2}]  }
   0x1   :  { %1626 = sst [smem:[#allocation20_spill]] %s1608_s1 }
   0x2   :  { %1627 = sst [smem:[#allocation21_spill]] %s1614_s7 }
   0x3   :  { %13 = vsyncpa [#allocation4], 0 }
   0x4   :  { %15 = vsyncpa [#allocation4 + $0x1], 0 }
   0x5   :  { %16 = vsyncpa [#allocation7], 0 }
   0x6   :  { %17 = vsyncpa [#allocation5], 0 }
   0x7   :  { %19 = vsyncpa [#allocation5 + $0x1], 0 }
   0x8   :  { %20 = vsyncpa [#allocation11], 0 }
   0x9   :  { %22 = vsyncpa [#allocation11 + $0x1], 0  ;;  %s1324_s24 = smov 0   ;;  %s1326_s25 = smov 0  }
   0xa   :  { %s1328_s26 = smov 0   ;;  %s1330_s27 = smov 0  }
   0xb   :  { %s1332_s28 = smov 0   ;;  %s1334_s29 = smov 0  }
   0xc LB: > { %1628 = sst [smem:[#allocation17_spill]] %s1250_s24  ;;  %s1355_s30 = sadd.s32 4294967295, %s1270_s29   ;;  %s1270_s29 = sphi %s1334_s29, %s28_s29   ;;  %s1266_s28 = sphi %s1332_s28, %s1658_s28   ;;  %s1262_s27 = sphi %s1330_s27, %s1657_s27   ;;  %s1258_s26 = sphi %s1328_s26, %s1656_s26   ;;  %s1254_s25 = sphi %s1326_s25, %s1655_s25   ;;  %s1250_s24 = sphi %s1324_s24, %s1654_s24  }
   0xd   : > { %1629 = sst [smem:[#allocation18_spill]] %s1270_s29  ;;  %s1620_s8 = sadd.s32 4294967294, %s1270_s29  }
   0xe   : > { %p56_p0 = scmp.ne.s32.totalorder %s1258_s26, %s1254_s25  ;;  %p57_p1 = scmp.eq.s32.totalorder %s1270_s29, 0 }
   0xf   : > { %p62_p2 = scmp.ne.s32.totalorder %s1254_s25, %s1250_s24  ;;  %p1616_p3 = scmp.eq.s32.totalorder %s1355_s30, 0 }
  0x10   : > { %p170_p4 = scmp.eq.s32.totalorder %s1355_s30, 1  ;;  %p1366_p5 = por %p57_p1, %p56_p0 }
  0x11   : > { %p176_p6 = scmp.eq.s32.totalorder %s1620_s8, 1  ;;  %p1374_p7 = por %p1616_p3, %p62_p2 }
  0x12   : > { %p1378_p8 = por %p170_p4, %p56_p0  ;;  %p864_p10 = scmp.ge.s32.totalorder %s1270_s29, 1 }
  0x13   : > { %s1631_s11 = scalar_select %p1374_p7, 1, 0 }
  0x14   : > { %s1632_s12 = scalar_select %p1378_p8, 1, 0 }
  0x15   : > { %p1382_p9 = por %p176_p6, %p62_p2  ;;  %p235_p11 = scmp.lt.s32.totalorder %s1270_s29, 3 }
  0x16   : > { %s1272_s15 = smov [#allocation6]   ;;  %p990_p1 = scmp.lt.s32.totalorder %s1270_s29, 2 }
  0x17   : > { %s1633_s13 = scalar_select %p1382_p9, 1, 0 }
  0x18   : > { %p1389_p13 = pnand %p864_p10, %p235_p11  ;;  %s248_s16 = sshll.u32 %s1272_s15, 4  ;;  %s249_s16 = int_to_ptr.vmem [resolvable:$true] %s248_s16 }
  0x19   : > { %1634 = sst [smem:[#allocation19_spill]] %s1633_s13  ;;  %p1398_p4 = pnand %p990_p1, %p1366_p5 }
  0x1a   : > { %s1635_s14 = scalar_select %p1389_p13, 1, 0 }
  0x1b   : > { %p967_p0 = pneg %p1389_p13  ;;  %s1273_s18 = smov [#allocation8]  }
  0x1c   : > { %s1636_s17 = scalar_select %p1398_p4, 1, 0 }
  0x1d   : > { %s264_s19 = sshll.u32 %s1273_s18, 4  ;;  %p1404_p2 = pnand %p967_p0, %p1616_p3  ;;  %s265_s19 = int_to_ptr.vmem [resolvable:$true] %s264_s19 }
  0x1e   : > { %s1061_s21 = scalar_lea.vmem %s249_s16, 128  ;;  %p1069_p1 = scmp.lt.s32.totalorder %s249_s16, %s249_s16 }
  0x1f   : > { %p1052_p6 = pneg %p1404_p2  ;;  %p1062_p10 = scmp.ne.s32.totalorder %s249_s16, %s1061_s21 }
  0x20   : > { %p1070_p12 = scmp.lt.s32.totalorder %s1061_s21, %s1061_s21 }
  0x21   : > { %p1064_p5 = pnand %p1062_p10, %p1052_p6 }
  0x22   : > { %p1071_p9 = por %p1070_p12, %p1069_p1 }
  0x23   : > { %p1065_p11 = pneg %p1064_p5 }
  0x25   : > { %p1072_p8 = pnand %p1071_p9, %p1065_p11 }
  0x27   : > { %1075 = shalt.err (!%p1072_p8)
}
  0x28   : > { %s1638_s1 = sld [smem:[#allocation20_spill]]  ;;  %s1087_s10 = scalar_lea.vmem %s265_s19, 2048 }
  0x29   : > { %p1088_p0 = scmp.ne.s32.totalorder %s265_s19, %s1087_s10  ;;  %p1095_p10 = scmp.lt.s32.totalorder %s265_s19, %s265_s19 }
  0x2a   : > { %p1096_p5 = scmp.lt.s32.totalorder %s1087_s10, %s1087_s10 }
  0x2b   : > { %p1090_p3 = pnand %p1088_p0, %p1052_p6 }
  0x2c   : > { %p1097_p13 = por %p1096_p5, %p1095_p10 }
  0x2d   : > { %p1091_p7 = pneg %p1090_p3 }
  0x2e   : > { %970 = dma.hbm_to_vmem [thread:$0]  (!%p1404_p2), %s1638_s1, 128, %s249_s16, [#allocation7]  }
  0x2f   : > { %p1098_p4 = pnand %p1097_p13, %p1091_p7 }
  0x31   : > { %1101 = shalt.err (!%p1098_p4)
}
  0x32   : > { %s1274_s15 = smov 128   ;;  %s1275_s18 = smov 8  }
  0x33   : > { %973 = dma.hbm_to_vmem [thread:$0]  (!%p1404_p2), %s1611_s4, 2048, %s265_s19, [#allocation7], %s1274_s15, %s1274_s15, %s1275_s18  }
  0x34   : > { %s278_s22 = sand.u32 1, %s1258_s26   ;;  %s40_s23 = sadd.s32 1, %s1266_s28 }
  0x35   : > { %s868_s8 = sshll.u32 %s278_s22, 7  ;;  %p42_p3 = scmp.ge.s32.totalorder %s40_s23, 2 }
  0x36   : > { %s891_s10 = sshll.u32 %s1266_s28, 11  ;;  %s282_s9 = scalar_lea.vmem [#allocation3], %s868_s8 }
  0x37   : > { %s292_s1 = sshll.u32 %s282_s9, 4  ;;  %s1660_s23 = smov (%p42_p3, %s40_s23), 0  ;;  %s293_s1 = int_to_ptr.vmem [resolvable:$true] %s292_s1 }
  0x38   : > { %s291_s24 = scalar_lea.hbm %s1607_s0, %s891_s10  ;;  %s44_s20 = ssub.s32 %s1266_s28, %s1660_s23 }
  0x39   : > { %p1436_p7 = scmp.eq.s32.totalorder %s44_s20, 0  ;;  %s279_s19 = scalar_lea.sflag [#allocation4], %s278_s22 }
  0x3a   : > { %p1640_p8 = scmp.ne.s32.totalorder %s1636_s17, 0  ;;  %s1115_s15 = scalar_lea.vmem %s293_s1, 2048 }
  0x3b   : > { %p1116_p12 = scmp.ne.s32.totalorder %s293_s1, %s1115_s15  ;;  %s1276_s8 = smov [#allocation3]  }
  0x3c   : > { %p1104_p9 = pneg %p1640_p8  ;;  %s1120_s9 = sshll.u32 %s1276_s8, 4  ;;  %s1121_s9 = int_to_ptr.vmem [resolvable:$false] %s1120_s9 }
  0x3d   : > { %s1122_s18 = scalar_lea.vmem %s1121_s9, 4096  ;;  %p1123_p2 = scmp.lt.s32.totalorder %s293_s1, %s1121_s9 }
  0x3e   : > { %p1118_p13 = pnand %p1116_p12, %p1104_p9  ;;  %p1124_p6 = scmp.lt.s32.totalorder %s1122_s18, %s1115_s15 }
  0x40   : > { %p1119_p4 = pneg %p1118_p13  ;;  %p1125_p11 = por %p1124_p6, %p1123_p2 }
  0x42   : > { %p1126_p1 = pnand %p1125_p11, %p1119_p4 }
  0x44   : > { %1129 = shalt.err (!%p1126_p1)
}
  0x45   : > { %s1277_s29 = smov 256   ;;  %s1278_s13 = smov 16  }
  0x46   : > { %977 = dma.hbm_to_vmem [thread:$0]  (!%p1640_p8), %s291_s24, 2048, %s293_s1, %s279_s19, %s1277_s29, %s1277_s29, %s1278_s13  }
  0x47   : > { %s1641_s16 = sadd.s32 1, %s1258_s26  ;;  %p1642_p0 = scmp.ne.s32.totalorder %s1635_s14, 0 }
  0x48   : > { %s1449_s21 = scalar_select %p1436_p7, %s1258_s26, %s1641_s16  }
  0x49   : > { %304 = sbr.rel (%p1642_p0) target bundleno = 674 (0x2a2), region = 40  ;;  %s1454_s22 = sand.u32 (!%p1642_p0), 1, %s1254_s25  }
  0x4a   : > { %s873_s10 = sshll.u32 (!%p1642_p0), %s1454_s22, 7  ;;  %s307_s20 = scalar_lea.sflag (!%p1642_p0), [#allocation4], %s1454_s22 }
  0x4b   : > { %s310_s15 = scalar_lea.vmem (!%p1642_p0), [#allocation3], %s873_s10  ;;  %p1643_p10 = scmp.ne.s32.totalorder (!%p1642_p0), %s1631_s11, 0 }
  0x4e   : > { %1233 = dma.done.wait (%p1643_p10), %s307_s20, 2048  }
  0x4f   : > { %1235 = vsyncadd (%p1643_p10), %s307_s20, 4294965248  ;;  %p1644_p5 = scmp.eq.s32.totalorder %s1355_s30, 0 }
  0x51   : > { %1237 = dma.done.wait (%p1644_p5), [#allocation7], 2176   ;;  %p1645_p3 = pmov %p1644_p5 }
  0x52   : > { %v368_v0 = vld [vmem:[%s310_s15] sm:$0xff]  ;;  %v369_v1 = vld [vmem:[%s310_s15 + $0x8] sm:$0xff]  ;;  %v370_v5 = vld [vmem:[%s310_s15 + $0x10] sm:$0xff]  ;;  %vm365_vm0 = vcmask 64512   ;;  %v1279_v24 = vmov 0.0   ;;  %vm1280_vm1 = vmmov 0   ;;  %v416_v39 = vlaneseq }
  0x53   : > { %1239 = vsyncadd (%p1645_p3), [#allocation7], 4294965120  ;;  %v372_v2 = vld [vmem:[%s310_s15 + $0x20] sm:$0xff]  ;;  %v384_v3 = vadd.f32 %v369_v1, %v368_v0  ;;  %v373_v4 = vld [vmem:[%s310_s15 + $0x28] sm:$0xff]  ;;  %911 = vmatprep.subr.mxu0 %v1279_v24  ;;  %366 = vst.msk [vmem:[#allocation2] sm:$0xff] %vm365_vm0, %v1279_v24  ;;  %916 = vmatprep.subr.mxu1 %v1279_v24  ;;  %vm450_vm2 = vcmask 1041409  }
  0x54   : > { %v371_v6 = vld [vmem:[%s310_s15 + $0x18] sm:$0xff]  ;;  %v390_v7 = vadd.f32 %v373_v4, %v372_v2  ;;  %v374_v8 = vld [vmem:[%s310_s15 + $0x30] sm:$0xff]  ;;  %v376_v12 = vld [vmem:[%s310_s15 + $0x40] sm:$0xff]  ;;  %913 = vmatprep.mubr.msk.f32.mxu0 %vm1280_vm1, %v1279_v24  ;;  %948 = vmatprep.mubr.msk.f32.mxu1 %vm1280_vm1, %v1279_v24  ;;  %v417_v40 = vand.u32 127, %v416_v39  ;;  %v419_v41 = vshrl.u32 %v416_v39, 7  ;;  %vm452_vm3 = vcmask 1042434  }
  0x55   : > { %v375_v9 = vld [vmem:[%s310_s15 + $0x38] sm:$0xff]  ;;  %385 = vadd.xlane.f32.xlu0 %v384_v3  ;;  %v387_v10 = vadd.f32 %v371_v6, %v370_v5  ;;  %v377_v13 = vld [vmem:[%s310_s15 + $0x48] sm:$0xff]  ;;  %v378_v14 = vld [vmem:[%s310_s15 + $0x50] sm:$0xff]  ;;  %vm454_vm4 = vcmask 1043459   ;;  %vm456_vm5 = vcmask 1044484   ;;  %vm458_vm6 = vcmask 1045509  }
  0x56   : > { %391 = vadd.xlane.f32.xlu1 %v390_v7  ;;  %v393_v11 = vadd.f32 %v375_v9, %v374_v8  ;;  %v379_v15 = vld [vmem:[%s310_s15 + $0x58] sm:$0xff]  ;;  %v396_v16 = vadd.f32 %v377_v13, %v376_v12  ;;  %v380_v18 = vld [vmem:[%s310_s15 + $0x60] sm:$0xff]  ;;  %v381_v19 = vld [vmem:[%s310_s15 + $0x68] sm:$0xff]  ;;  %v420_v43 = vsub.s32 %v417_v40, %v419_v41  ;;  %vm460_vm7 = vcmask 1046534   ;;  %s1493_s24 = sshll.u32 %s1454_s22, 3  ;;  %s1500_s19 = sshll.u32 %s1262_s27, 7 }
  0x57   : > { %v399_v17 = vadd.f32 %v379_v15, %v378_v14  ;;  %v382_v20 = vld [vmem:[%s310_s15 + $0x70] sm:$0xff]  ;;  %v383_v21 = vld [vmem:[%s310_s15 + $0x78] sm:$0xff]  ;;  %v402_v22 = vadd.f32 %v381_v19, %v380_v18  ;;  %v472_v25 = vld [vmem:[#allocation6] sm:$0xff]  ;;  %vm462_vm8 = vcmask 1047559   ;;  %s344_s17 = scalar_lea.vmem [#allocation9], %s1493_s24  ;;  %s673_s18 = scalar_lea.hbm %s1612_s5, %s1500_s19 }
  0x58   : > { %v405_v23 = vadd.f32 %v383_v21, %v382_v20  ;;  %912 = vmatpush3.msra.mxu0 %v472_v25  ;;  %v578_v26 = vld [vmem:[#allocation8 + $0x78] sm:$0xff]  ;;  %v577_v27 = vld [vmem:[#allocation8 + $0x70] sm:$0xff]  ;;  %v576_v28 = vld [vmem:[#allocation8 + $0x68] sm:$0xff]  ;;  %s675_s29 = sshll.u32 %s344_s17, 4  ;;  %s652_s13 = scalar_lea.sflag [#allocation5], %s1454_s22  ;;  %s676_s29 = int_to_ptr.vmem [resolvable:$true] %s675_s29 }
  0x59   : > { %388 = vadd.xlane.f32.xlu0 %v387_v10  ;;  %917 = vmatpush3.msra.mxu1 %v578_v26  ;;  %v575_v29 = vld [vmem:[#allocation8 + $0x60] sm:$0xff]  ;;  %v574_v30 = vld [vmem:[#allocation8 + $0x58] sm:$0xff]  ;;  %v573_v31 = vld [vmem:[#allocation8 + $0x50] sm:$0xff]  ;;  %s1130_s16 = scalar_lea.vmem %s676_s29, 128  ;;  %p1646_p8 = scmp.ne.s32.totalorder %s1632_s12, 0 }
  0x5a   : > { %394 = vadd.xlane.f32.xlu1 %v393_v11  ;;  %918 = vmatprep.subr.mxu1 %v1279_v24  ;;  %v572_v32 = vld [vmem:[#allocation8 + $0x48] sm:$0xff]  ;;  %v571_v33 = vld [vmem:[#allocation8 + $0x40] sm:$0xff]  ;;  %v570_v34 = vld [vmem:[#allocation8 + $0x38] sm:$0xff]  ;;  %p1131_p7 = scmp.ne.s32.totalorder %s676_s29, %s1130_s16  ;;  %s1281_s10 = smov [#allocation9]  }
  0x5b   : > { %919 = vmatpush3.msra.mxu1 %v577_v27  ;;  %v569_v35 = vld [vmem:[#allocation8 + $0x30] sm:$0xff]  ;;  %v568_v36 = vld [vmem:[#allocation8 + $0x28] sm:$0xff]  ;;  %v567_v37 = vld [vmem:[#allocation8 + $0x20] sm:$0xff]  ;;  %s1134_s20 = sshll.u32 %s1281_s10, 4  ;;  %s1135_s20 = int_to_ptr.vmem [resolvable:$false] %s1134_s20 }
  0x5c   : > { %920 = vmatprep.subr.mxu1 %v1279_v24  ;;  %v566_v38 = vld [vmem:[#allocation8 + $0x18] sm:$0xff]  ;;  %v367_v0 = vld [vmem:[#allocation2] sm:$0xff]  ;;  %v564_v6 = vld [vmem:[#allocation8 + $0x8] sm:$0xff]  ;;  %p1132_p9 = pnand %p1131_p7, %p1646_p8  ;;  %s1136_s15 = scalar_lea.vmem %s1135_s20, 256 }
  0x5d   : > { %397 = vadd.xlane.f32.xlu0 %v396_v16  ;;  %921 = vmatpush3.msra.mxu1 %v576_v28  ;;  %v565_v5 = vld [vmem:[#allocation8 + $0x10] sm:$0xff]  ;;  %v563_v7 = vld [vmem:[#allocation8] sm:$0xff]  ;;  %p1137_p13 = scmp.lt.s32.totalorder %s676_s29, %s1135_s20  ;;  %p1138_p4 = scmp.lt.s32.totalorder %s1136_s15, %s1130_s16 }
  0x5e   : > { %400 = vadd.xlane.f32.xlu1 %v399_v17  ;;  %922 = vmatprep.subr.mxu1 %v1279_v24  ;;  %v880_v8 = vld [vmem:[%s1609_s2] ss:$0 sm:$0xff]  ;;  %p1133_p12 = pneg %p1132_p9 }
  0x5f   : > { %923 = vmatpush3.msra.mxu1 %v575_v29  ;;  %v881_v10 = vld [vmem:[%s1610_s3] ss:$0 sm:$0xff]  ;;  %p1139_p2 = por %p1138_p4, %p1137_p13 }
  0x60   : > { %924 = vmatprep.subr.mxu1 %v1279_v24 }
  0x61   : > { %403 = vadd.xlane.f32.xlu0 %v402_v22  ;;  %925 = vmatpush3.msra.mxu1 %v574_v30  ;;  %p1140_p6 = pnand %p1139_p2, %p1133_p12 }
  0x62   : > { %406 = vadd.xlane.f32.xlu1 %v405_v23  ;;  %926 = vmatprep.subr.mxu1 %v1279_v24 }
  0x63   : > { %927 = vmatpush3.msra.mxu1 %v573_v31 }
  0x64   : > { %928 = vmatprep.subr.mxu1 %v1279_v24 }
  0x65   : > { %929 = vmatpush3.msra.mxu1 %v572_v32 }
  0x66   : > { %930 = vmatprep.subr.mxu1 %v1279_v24 }
  0x67   : > { %931 = vmatpush3.msra.mxu1 %v571_v33 }
  0x68   : > { %932 = vmatprep.subr.mxu1 %v1279_v24 }
  0x69   : > { %933 = vmatpush3.msra.mxu1 %v570_v34 }
  0x6a   : > { %934 = vmatprep.subr.mxu1 %v1279_v24 }
  0x6b   : > { %935 = vmatpush3.msra.mxu1 %v569_v35 }
  0x6c   : > { %936 = vmatprep.subr.mxu1 %v1279_v24 }
  0x6d   : > { %937 = vmatpush3.msra.mxu1 %v568_v36 }
  0x6e   : > { %938 = vmatprep.subr.mxu1 %v1279_v24 }
  0x6f   : > { %939 = vmatpush3.msra.mxu1 %v567_v37 }
  0x70   : > { %940 = vmatprep.subr.mxu1 %v1279_v24 }
  0x71   : > { %941 = vmatpush3.msra.mxu1 %v566_v38 }
  0x72   : > { %942 = vmatprep.subr.mxu1 %v1279_v24 }
  0x73   : > { %943 = vmatpush3.msra.mxu1 %v565_v5 }
  0x74   : > { %944 = vmatprep.subr.mxu1 %v1279_v24 }
  0x75   : > { %945 = vmatpush3.msra.mxu1 %v564_v6 }
  0x76   : > { %946 = vmatprep.subr.mxu1 %v1279_v24 }
  0x77   : > { %947 = vmatpush3.msra.mxu1 %v563_v7 }
  0xde   : > { %v386_v42 = vpop.xlane.xlu0 %385 }
  0xdf   : > { %v392_v44 = vpop.xlane.xlu1 %391  ;;  %v421_v46 = vrot.slane %v386_v42, %v420_v43 }
  0xe0   : > { %v429_v49 = vrot.slane %v392_v44, %v420_v43 }
  0xe2   : > { %v389_v45 = vpop.xlane.xlu0 %388 }
  0xe3   : > { %v425_v47 = vrot.slane %v389_v45, %v420_v43  ;;  %v395_v48 = vpop.xlane.xlu1 %394 }
  0xe4   : > { %v433_v50 = vrot.slane %v395_v48, %v420_v43 }
  0xe5   : > { %v451_v51 = vsel %vm450_vm2, %v425_v47, %v421_v46 }
  0xe6   : > { %v453_v52 = vsel %vm452_vm3, %v429_v49, %v451_v51  ;;  %v398_v53 = vpop.xlane.xlu0 %397 }
  0xe7   : > { %v455_v54 = vsel %vm454_vm4, %v433_v50, %v453_v52  ;;  %v437_v55 = vrot.slane %v398_v53, %v420_v43  ;;  %v401_v56 = vpop.xlane.xlu1 %400 }
  0xe8   : > { %v441_v57 = vrot.slane %v401_v56, %v420_v43 }
  0xe9   : > { %v457_v58 = vsel %vm456_vm5, %v437_v55, %v455_v54 }
  0xea   : > { %v404_v59 = vpop.xlane.xlu0 %403  ;;  %v459_v62 = vsel %vm458_vm6, %v441_v57, %v457_v58 }
  0xeb   : > { %v445_v60 = vrot.slane %v404_v59, %v420_v43  ;;  %v407_v61 = vpop.xlane.xlu1 %406 }
  0xec   : > { %v449_v63 = vrot.slane %v407_v61, %v420_v43 }
  0xed   : > { %v461_v1 = vsel %vm460_vm7, %v445_v60, %v459_v62 }
  0xee   : > { %v463_v2 = vsel %vm462_vm8, %v449_v63, %v461_v1 }
  0xef   : > { %v465_v3 = vadd.f32 %v463_v2, %v367_v0 }
  0xf1   : > { %467 = vst.msk [vmem:[#allocation2] sm:$0xff] %vm365_vm0, %v465_v3 }
  0xf8   : > { %v471_v4 = vld [vmem:[#allocation2] sm:$0xff] }
  0xf9   : > { %914 = vmatmul.mubr.msk.f32.vlgmr.msra.gmra.mxu0 %vm365_vm0, %v471_v4 }
 0x1b9   : > { %v542_v9 = vpop.f32.mrf.mxu0 }
 0x1ba   : > { %v553_v11 = vmul.f32 %v880_v8, %v542_v9 }
 0x1bb   : > { %v915_v12 = vpop.f32.mrf.mxu0 }
 0x1bc   : > { %v561_v13 = vadd.f32 %v881_v10, %v553_v11 }
 0x1be   : > { %949 = vmatmul.mubr.f32.vlgmr.msra.gmra.mxu1 %v561_v13  ;;  %562 = vst [vmem:[%s344_s17] sm:$0xff] %v561_v13 }
 0x1bf   : > { %1143 = shalt.err (!%p1140_p6)
}
 0x1c0   : > { %s1144_s27 = scalar_lea.hbm %s673_s18, 128  ;;  %s1148_s7 = scalar_lea.hbm %s1612_s5, 256 }
 0x1c1   : > { %p1145_p11 = scmp.ne.s32.totalorder %s673_s18, %s1144_s27  ;;  %p1149_p10 = scmp.lt.s32.totalorder %s673_s18, %s1612_s5 }
 0x1c2   : > { %p1150_p5 = scmp.lt.s32.totalorder %s1148_s7, %s1144_s27 }
 0x1c3   : > { %p1146_p1 = pnand %p1145_p11, %p1646_p8 }
 0x1c4   : > { %p1151_p3 = por %p1150_p5, %p1149_p10 }
 0x1c5   : > { %p1147_p0 = pneg %p1146_p1 }
 0x1c7   : > { %p1152_p7 = pnand %p1151_p3, %p1147_p0 }
 0x1c9   : > { %1155 = shalt.err (!%p1152_p7)
}
 0x1ca   : > { %961 = dma.vmem_to_hbm [thread:$0]  (%p1646_p8), %s676_s29, 128, %s673_s18, %s652_s13  }
 0x1cb   : > { %s351_s17 = scalar_lea.vmem [#allocation10], %s1493_s24  ;;  %s656_s9 = sand.u32 1, %s1355_s30  }
 0x1cc   : > { %s688_s8 = sshll.u32 %s351_s17, 4  ;;  %s358_s16 = scalar_lea.vmem [#allocation12], %s1493_s24  ;;  %s1522_s8 = int_to_ptr.vmem [resolvable:$true] %s688_s8 }
 0x1cd   : > { %s701_s10 = sshll.u32 %s358_s16, 4  ;;  %s1528_s27 = scalar_lea.hbm %s1613_s6, %s1500_s19  ;;  %s1530_s10 = int_to_ptr.vmem [resolvable:$true] %s701_s10 }
 0x1ce   : > { %s1647_s13 = sld [smem:[#allocation21_spill]]  ;;  %s1538_s30 = scalar_lea.sflag [#allocation11], %s656_s9 }
 0x1cf   : > { %s1156_s24 = scalar_lea.vmem %s1522_s8, 128  ;;  %s1282_s1 = smov [#allocation10]  }
 0x1d0   : > { %p1157_p9 = scmp.ne.s32.totalorder %s1522_s8, %s1156_s24  ;;  %s1160_s7 = sshll.u32 %s1282_s1, 4  ;;  %s1161_s7 = int_to_ptr.vmem [resolvable:$false] %s1160_s7 }
 0x1d1   : > { %s1162_s11 = scalar_lea.vmem %s1161_s7, 256  ;;  %p1163_p4 = scmp.lt.s32.totalorder %s1522_s8, %s1161_s7 }
 0x1d2   : > { %p1158_p12 = pnand %p1157_p9, %p1646_p8  ;;  %p1164_p2 = scmp.lt.s32.totalorder %s1162_s11, %s1156_s24 }
 0x1d4   : > { %s1536_s22 = scalar_lea.hbm %s1647_s13, %s1500_s19  ;;  %p1159_p13 = pneg %p1158_p12 }
 0x1d5   : > { %p1165_p6 = por %p1164_p2, %p1163_p4 }
 0x1d7   : > { %p1166_p11 = pnand %p1165_p6, %p1159_p13 }
 0x27e   : > { %v645_v14 = vpop.f32.mrf.mxu1 }
 0x27f   : > { %649 = vst [vmem:[%s351_s17] sm:$0xff] %v645_v14  ;;  %650 = vst [vmem:[%s358_s16] sm:$0xff] %v645_v14 }
 0x280   : > { %v950_v15 = vpop.f32.mrf.mxu1 }
 0x281   : > { %1169 = shalt.err (!%p1166_p11)
}
 0x282   : > { %s1170_s19 = scalar_lea.hbm %s1528_s27, 128  ;;  %s1174_s9 = scalar_lea.hbm %s1613_s6, 256 }
 0x283   : > { %p1171_p1 = scmp.ne.s32.totalorder %s1528_s27, %s1170_s19  ;;  %p1175_p5 = scmp.lt.s32.totalorder %s1528_s27, %s1613_s6 }
 0x284   : > { %p1176_p3 = scmp.lt.s32.totalorder %s1174_s9, %s1170_s19 }
 0x285   : > { %p1172_p0 = pnand %p1171_p1, %p1646_p8 }
 0x286   : > { %p1177_p7 = por %p1176_p3, %p1175_p5 }
 0x287   : > { %p1173_p10 = pneg %p1172_p0 }
 0x289   : > { %p1178_p9 = pnand %p1177_p7, %p1173_p10 }
 0x28b   : > { %1181 = shalt.err (!%p1178_p9)
}
 0x28c   : > { %962 = dma.vmem_to_hbm [thread:$0]  (%p1646_p8), %s1522_s8, 128, %s1528_s27, %s1538_s30  }
 0x28d   : > { %s1182_s15 = scalar_lea.vmem %s1530_s10, 128  ;;  %s1283_s18 = smov [#allocation12]  }
 0x28e   : > { %p1183_p12 = scmp.ne.s32.totalorder %s1530_s10, %s1182_s15  ;;  %s1186_s29 = sshll.u32 %s1283_s18, 4  ;;  %s1187_s29 = int_to_ptr.vmem [resolvable:$false] %s1186_s29 }
 0x28f   : > { %s1188_s24 = scalar_lea.vmem %s1187_s29, 256  ;;  %p1189_p2 = scmp.lt.s32.totalorder %s1530_s10, %s1187_s29 }
 0x290   : > { %p1184_p13 = pnand %p1183_p12, %p1646_p8  ;;  %p1190_p6 = scmp.lt.s32.totalorder %s1188_s24, %s1182_s15 }
 0x292   : > { %p1185_p4 = pneg %p1184_p13  ;;  %p1191_p11 = por %p1190_p6, %p1189_p2 }
 0x294   : > { %p1192_p1 = pnand %p1191_p11, %p1185_p4 }
 0x296   : > { %1195 = shalt.err (!%p1192_p1)
}
 0x297   : > { %s1196_s1 = scalar_lea.hbm %s1536_s22, 128  ;;  %s1200_s7 = scalar_lea.hbm %s1647_s13, 256 }
 0x298   : > { %p1197_p0 = scmp.ne.s32.totalorder %s1536_s22, %s1196_s1  ;;  %p1201_p3 = scmp.lt.s32.totalorder %s1536_s22, %s1647_s13 }
 0x299   : > { %p1202_p7 = scmp.lt.s32.totalorder %s1200_s7, %s1196_s1 }
 0x29a   : > { %p1198_p10 = pnand %p1197_p0, %p1646_p8 }
 0x29b   : > { %p1203_p9 = por %p1202_p7, %p1201_p3 }
 0x29c   : > { %p1199_p5 = pneg %p1198_p10 }
 0x29e   : > { %p1204_p12 = pnand %p1203_p9, %p1199_p5 }
 0x2a0   : > { %1207 = shalt.err (!%p1204_p12)
}
 0x2a1   : > { %963 = dma.vmem_to_hbm [thread:$0]  (%p1646_p8), %s1530_s10, 128, %s1536_s22, %s1538_s30  }
 0x2a2 PF: > { %s1648_s14 = sld [smem:[#allocation17_spill]] }
 0x2a3   : > { %s1649_s17 = sld [smem:[#allocation19_spill]] }
 0x2a4   : > { %s1650_s9 = sld [smem:[#allocation18_spill]] }
 0x2a8   : > { %s713_s16 = sand.u32 1, %s1648_s14  }
 0x2a9   : > { %p1651_p13 = scmp.ne.s32.totalorder %s1649_s17, 0  ;;  %s714_s20 = scalar_lea.sflag [#allocation5], %s713_s16 }
 0x2aa   : > { %p1652_p4 = scmp.ge.s32.totalorder %s1650_s9, 2 }
 0x2ac   : > { %p979_p2 = pnand %p1652_p4, %p1651_p13 }
 0x2ae   : > { %p980_p6 = pneg %p979_p2 }
 0x2b0   : > { %1241 = dma.done.wait (%p980_p6), %s714_s20, 128  }
 0x2b1   : > { %1243 = vsyncadd (%p980_p6), %s714_s20, 4294967168  ;;  %s1653_s15 = sadd.s32 4294967294, %s1650_s9  }
 0x2b2   : > { %s722_s18 = sand.u32 1, %s1653_s15  }
 0x2b3   : > { %s723_s12 = scalar_lea.sflag [#allocation11], %s722_s18 }
 0x2b4   : > { %1245 = dma.done.wait (%p980_p6), %s723_s12, 256  }
 0x2b5   : > { %1247 = vsyncadd (%p980_p6), %s723_s12, 4294967040  ;;  %s28_s29 = sadd.s32 1, %s1650_s9   ;;  %s1654_s24 = smov %s1254_s25 }
 0x2b6   : > { %p25_p8 = scmp.ge.s32.totalorder %s28_s29, 4   ;;  %s1655_s25 = smov %s1258_s26 }
 0x2b7   : > { %s1656_s26 = smov %s1449_s21  ;;  %s1657_s27 = smov %s1266_s28 }
 0x2b8   : > { %s1658_s28 = smov %s1660_s23  ;;  %27 = sbr.rel (!%p25_p8) target bundleno = 12 (0xc), region = 133 }
 0x2bd   :  { %737 = vsyncpa [#allocation4], 1 }
 0x2be   :  { %739 = vsyncpa [#allocation4 + $0x1], 1 }
 0x2bf   :  { %740 = vsyncpa [#allocation7], 1 }
 0x2c0   :  { %741 = vsyncpa [#allocation5], 1 }
 0x2c1   :  { %743 = vsyncpa [#allocation5 + $0x1], 1 }
 0x2c2   :  { %744 = vsyncpa [#allocation11], 1 }
 0x2c3   :  { %746 = vsyncpa [#allocation11 + $0x1], 1 }

</bundles_post_ra>
